<compile_context>
chip_gen: v6e
topology: v6e:2x2x1
jax: 0.10.0
libtpu: 0.0.40
codegen_flags: <defaults>
</compile_context>

<pallas_src>
import jax
import jax.numpy as jnp
from jax.experimental import pallas as pl
from jax.experimental.pallas import tpu as pltpu


def _mean_max_pool_kernel(hs_ref, mask_ref, w_ref, b_ref, out_ref,
                          sum_ref, max_ref, cnt_ref):
    """Grid: (batch tiles, seq tiles); seq axis (1) is the reduction axis.

    hs_ref  : [tb, ts, H]  tile of last_hidden_state
    mask_ref: [tb, ts, 1]  attention mask tile (float)
    w_ref   : [2H, C]      fc weight (resident, constant index_map)
    b_ref   : [1, C]       fc bias
    out_ref : [tb, C]      logits for this batch tile
    sum_ref : [tb, H] f32  running masked sum      (VMEM scratch)
    max_ref : [tb, H] f32  running masked max      (VMEM scratch)
    cnt_ref : [tb, 1] f32  running unmasked count  (VMEM scratch)
    """
    si = pl.program_id(1)
    ns = pl.num_programs(1)

    @pl.when(si == 0)
    def _():
        sum_ref[...] = jnp.zeros_like(sum_ref)
        max_ref[...] = jnp.full_like(max_ref, -1e9)   # matches torch's -1e9 fill
        cnt_ref[...] = jnp.zeros_like(cnt_ref)

    hs = hs_ref[...].astype(jnp.float32)     # [tb, ts, H]
    m = mask_ref[...].astype(jnp.float32)    # [tb, ts, 1]

    # torch does the -1e9 fill in place; the sum multiplies by the mask so the
    # fill only affects the max (exactly reproduced here).
    masked = jnp.where(m == 0.0, jnp.float32(-1e9), hs)
    max_ref[...] = jnp.maximum(max_ref[...], masked.max(axis=1))
    sum_ref[...] += (hs * m).sum(axis=1)
    cnt_ref[...] += m.sum(axis=1)

    @pl.when(si == ns - 1)
    def _():
        h = sum_ref.shape[-1]
        denom = jnp.maximum(cnt_ref[...], jnp.float32(1e-9))   # torch.clamp(min=1e-9)
        mean = sum_ref[...] / denom                            # [tb, H]
        # concat(mean, max) @ W == mean @ W[:H] + max @ W[H:]
        logits = (jnp.dot(mean, w_ref[:h, :].astype(jnp.float32),
                          preferred_element_type=jnp.float32)
                  + jnp.dot(max_ref[...], w_ref[h:, :].astype(jnp.float32),
                            preferred_element_type=jnp.float32)
                  + b_ref[...].astype(jnp.float32))
        out_ref[...] = logits.astype(out_ref.dtype)


def mean_max_pooling(last_hidden_state, attention_mask, w, b,
                     *, seq_tile=None, batch_tile=None):
    """last_hidden_state: [B, S, H]; attention_mask: [B, S]; w: [2H, C]; b: [C]."""
    B, S, H = last_hidden_state.shape
    H2, C = w.shape
    assert H2 == 2 * H, "fc weight must be [2*hidden_size, num_classes]"

    ts = S if seq_tile is None else seq_tile
    tb = B if batch_tile is None else batch_tile
    assert S % ts == 0 and B % tb == 0

    mask_f = attention_mask.astype(jnp.float32)[:, :, None]   # [B, S, 1]
    b2 = b.reshape(1, C)

    grid_spec = pltpu.PrefetchScalarGridSpec(
        num_scalar_prefetch=0,
        grid=(B // tb, S // ts),
        in_specs=[
            pl.BlockSpec((tb, ts, H), lambda bi, si: (bi, si, 0)),
            pl.BlockSpec((tb, ts, 1), lambda bi, si: (bi, si, 0)),
            pl.BlockSpec((2 * H, C), lambda bi, si: (0, 0)),
            pl.BlockSpec((1, C), lambda bi, si: (0, 0)),
        ],
        out_specs=pl.BlockSpec((tb, C), lambda bi, si: (bi, 0)),
        scratch_shapes=[
            pltpu.VMEM((tb, H), jnp.float32),   # running masked sum
            pltpu.VMEM((tb, H), jnp.float32),   # running masked max
            pltpu.VMEM((tb, 1), jnp.float32),   # running token count
        ],
    )

    return pl.pallas_call(
        _mean_max_pool_kernel,
        out_shape=jax.ShapeDtypeStruct((B, C), jnp.float32),
        grid_spec=grid_spec,
        compiler_params=pltpu.CompilerParams(
            dimension_semantics=("parallel", "arbitrary")),
    )(last_hidden_state, mask_f, w, b2)


if __name__ == "__main__":
    # TODO(synk): train-mode nn.Dropout / MultiDropout is stochastic; in eval both
    # branches reduce to fc(mean_max_embeddings), which is what is implemented.
    key = jax.random.PRNGKey(0)
    B, S, H, C = 2, 16, 32, 3          # small shapes; Linear(2*H, C)

    k1, k2, k3 = jax.random.split(key, 3)
    last_hidden_state = jax.random.normal(k1, (B, S, H), jnp.float32)
    # mask out the tail of the second sequence to exercise the masking path
    attention_mask = jnp.concatenate(
        [jnp.ones((1, S), jnp.int32),
         jnp.concatenate([jnp.ones((1, S - 5), jnp.int32),
                          jnp.zeros((1, 5), jnp.int32)], axis=1)], axis=0)
    w = 0.02 * jax.random.normal(k2, (2 * H, C), jnp.float32)   # stored as [2H, C]
    b = 0.02 * jax.random.normal(k3, (C,), jnp.float32)

    out = mean_max_pooling(last_hidden_state, attention_mask, w, b, seq_tile=8)
    out = jax.block_until_ready(out)

    # pure-JAX reference
    m = attention_mask.astype(jnp.float32)[:, :, None]
    masked = jnp.where(m == 0.0, -1e9, last_hidden_state)
    max_emb = masked.max(axis=1)
    sum_emb = (masked * m).sum(axis=1)
    sum_mask = jnp.clip(m.sum(axis=1), 1e-9, None)
    mean_emb = sum_emb / sum_mask
    ref = jnp.concatenate([mean_emb, max_emb], axis=1) @ w + b

    assert out.shape == (B, C)
    assert jnp.allclose(out, ref, atol=1e-4, rtol=1e-4)

    print("KERNEL_OK")
</pallas_src>

<mosaic_0001>
module attributes {stable_mosaic.version = 11 : i64} {
  func.func @_mean_max_pool_kernel(%arg0: i32, %arg1: i32, %arg2: memref<2x8x32xf32, #tpu.memory_space<vmem>>, %arg3: memref<2x8x1xf32, #tpu.memory_space<vmem>>, %arg4: memref<64x3xf32, #tpu.memory_space<vmem>>, %arg5: memref<1x3xf32, #tpu.memory_space<vmem>>, %arg6: memref<2x3xf32, #tpu.memory_space<vmem>>, %arg7: memref<2x32xf32, #tpu.memory_space<vmem>>, %arg8: memref<2x32xf32, #tpu.memory_space<vmem>>, %arg9: memref<2x1xf32, #tpu.memory_space<vmem>>) attributes {dimension_semantics = [#tpu.dimension_semantics<parallel>, #tpu.dimension_semantics<arbitrary>], iteration_bounds = array<i64: 1, 2>, scalar_prefetch = 0 : i64, scratch_operands = 3 : i64, tpu.core_type = #tpu.core_type<tc>, window_params = [{transform_indices = @transform_0, window_bounds = array<i64: 2, 8, 32>}, {transform_indices = @transform_1, window_bounds = array<i64: 2, 8, 1>}, {pipeline_mode = #tpu.pipeline_mode<synchronous>, transform_indices = @transform_2, window_bounds = array<i64: 64, 3>}, {pipeline_mode = #tpu.pipeline_mode<synchronous>, transform_indices = @transform_3, window_bounds = array<i64: 1, 3>}, {transform_indices = @transform_4, window_bounds = array<i64: 2, 3>}]} {
    %c0_i32 = arith.constant 0 : i32
    %0 = arith.cmpi eq, %arg1, %c0_i32 : i32
    %1 = arith.extui %0 : i1 to i32
    %c0_i32_0 = arith.constant 0 : i32
    %2 = arith.cmpi ne, %1, %c0_i32_0 : i32
    scf.if %2 {
      %cst_23 = arith.constant 0.000000e+00 : f32
      %28 = vector.broadcast %cst_23 : f32 to vector<2x32xf32>
      %c0_24 = arith.constant 0 : index
      %c0_25 = arith.constant 0 : index
      %29 = vector.load %arg7[%c0_24, %c0_25] : memref<2x32xf32, #tpu.memory_space<vmem>>, vector<2x32xf32>
      tpu.vector_store %arg7[%c0_24, %c0_25], %28 {strides = array<i32>} : memref<2x32xf32, #tpu.memory_space<vmem>>, vector<2x32xf32>,
      %cst_26 = arith.constant -1.000000e+09 : f32
      %30 = vector.broadcast %cst_26 : f32 to vector<2x32xf32>
      %c0_27 = arith.constant 0 : index
      %c0_28 = arith.constant 0 : index
      %31 = vector.load %arg8[%c0_27, %c0_28] : memref<2x32xf32, #tpu.memory_space<vmem>>, vector<2x32xf32>
      tpu.vector_store %arg8[%c0_27, %c0_28], %30 {strides = array<i32>} : memref<2x32xf32, #tpu.memory_space<vmem>>, vector<2x32xf32>,
      %cst_29 = arith.constant 0.000000e+00 : f32
      %32 = vector.broadcast %cst_29 : f32 to vector<2x1xf32>
      %c0_30 = arith.constant 0 : index
      %c0_31 = arith.constant 0 : index
      %33 = vector.load %arg9[%c0_30, %c0_31] : memref<2x1xf32, #tpu.memory_space<vmem>>, vector<2x1xf32>
      tpu.vector_store %arg9[%c0_30, %c0_31], %32 {strides = array<i32>} : memref<2x1xf32, #tpu.memory_space<vmem>>, vector<2x1xf32>,
    } else {
    }
    %c0 = arith.constant 0 : index
    %c0_1 = arith.constant 0 : index
    %c0_2 = arith.constant 0 : index
    %3 = vector.load %arg2[%c0, %c0_1, %c0_2] : memref<2x8x32xf32, #tpu.memory_space<vmem>>, vector<2x8x32xf32>
    %c0_3 = arith.constant 0 : index
    %c0_4 = arith.constant 0 : index
    %c0_5 = arith.constant 0 : index
    %4 = vector.load %arg3[%c0_3, %c0_4, %c0_5] : memref<2x8x1xf32, #tpu.memory_space<vmem>>, vector<2x8x1xf32>
    %cst = arith.constant 0.000000e+00 : f32
    %5 = vector.broadcast %cst : f32 to vector<2x8x1xf32>
    %6 = arith.cmpf oeq, %4, %5 : vector<2x8x1xf32>
    %cst_6 = arith.constant -1.000000e+09 : f32
    %7 = vector.shape_cast %6 : vector<2x8x1xi1> to vector<2x8x1xi1>
    %8 = vector.broadcast %7 : vector<2x8x1xi1> to vector<2x8x32xi1>
    %9 = vector.broadcast %cst_6 : f32 to vector<2x8x32xf32>
    %10 = arith.select %8, %9, %3 : vector<2x8x32xi1>, vector<2x8x32xf32>
    %c0_7 = arith.constant 0 : index
    %c0_8 = arith.constant 0 : index
    %11 = vector.load %arg8[%c0_7, %c0_8] : memref<2x32xf32, #tpu.memory_space<vmem>>, vector<2x32xf32>
    %cst_9 = arith.constant dense<0xFF800000> : vector<2x32xf32>
    %12 = vector.multi_reduction <maximumf>, %10, %cst_9 [1] : vector<2x8x32xf32> to vector<2x32xf32>
    %13 = arith.maximumf %11, %12 : vector<2x32xf32>
    %c0_10 = arith.constant 0 : index
    %c0_11 = arith.constant 0 : index
    %14 = vector.load %arg8[%c0_10, %c0_11] : memref<2x32xf32, #tpu.memory_space<vmem>>, vector<2x32xf32>
    tpu.vector_store %arg8[%c0_10, %c0_11], %13 {strides = array<i32>} : memref<2x32xf32, #tpu.memory_space<vmem>>, vector<2x32xf32>,
    %c0_12 = arith.constant 0 : index
    %c0_13 = arith.constant 0 : index
    %15 = vector.load %arg7[%c0_12, %c0_13] : memref<2x32xf32, #tpu.memory_space<vmem>>, vector<2x32xf32>
    %16 = vector.broadcast %4 : vector<2x8x1xf32> to vector<2x8x32xf32>
    %17 = arith.mulf %3, %16 : vector<2x8x32xf32>
    %cst_14 = arith.constant dense<0.000000e+00> : vector<2x32xf32>
    %18 = vector.multi_reduction <add>, %17, %cst_14 [1] : vector<2x8x32xf32> to vector<2x32xf32>
    %19 = arith.addf %15, %18 : vector<2x32xf32>
    %c0_15 = arith.constant 0 : index
    %c0_16 = arith.constant 0 : index
    %20 = vector.load %arg7[%c0_15, %c0_16] : memref<2x32xf32, #tpu.memory_space<vmem>>, vector<2x32xf32>
    tpu.vector_store %arg7[%c0_15, %c0_16], %19 {strides = array<i32>} : memref<2x32xf32, #tpu.memory_space<vmem>>, vector<2x32xf32>,
    %c0_17 = arith.constant 0 : index
    %c0_18 = arith.constant 0 : index
    %21 = vector.load %arg9[%c0_17, %c0_18] : memref<2x1xf32, #tpu.memory_space<vmem>>, vector<2x1xf32>
    %cst_19 = arith.constant dense<0.000000e+00> : vector<2x1xf32>
    %22 = vector.multi_reduction <add>, %4, %cst_19 [1] : vector<2x8x1xf32> to vector<2x1xf32>
    %23 = arith.addf %21, %22 : vector<2x1xf32>
    %c0_20 = arith.constant 0 : index
    %c0_21 = arith.constant 0 : index
    %24 = vector.load %arg9[%c0_20, %c0_21] : memref<2x1xf32, #tpu.memory_space<vmem>>, vector<2x1xf32>
    tpu.vector_store %arg9[%c0_20, %c0_21], %23 {strides = array<i32>} : memref<2x1xf32, #tpu.memory_space<vmem>>, vector<2x1xf32>,
    %c1_i32 = arith.constant 1 : i32
    %25 = arith.cmpi eq, %arg1, %c1_i32 : i32
    %26 = arith.extui %25 : i1 to i32
    %c0_i32_22 = arith.constant 0 : i32
    %27 = arith.cmpi ne, %26, %c0_i32_22 : i32
    scf.if %27 {
      %c0_23 = arith.constant 0 : index
      %c0_24 = arith.constant 0 : index
      %28 = vector.load %arg9[%c0_23, %c0_24] : memref<2x1xf32, #tpu.memory_space<vmem>>, vector<2x1xf32>
      %cst_25 = arith.constant 9.99999971E-10 : f32
      %29 = vector.broadcast %cst_25 : f32 to vector<2x1xf32>
      %30 = arith.maximumf %28, %29 : vector<2x1xf32>
      %c0_26 = arith.constant 0 : index
      %c0_27 = arith.constant 0 : index
      %31 = vector.load %arg7[%c0_26, %c0_27] : memref<2x32xf32, #tpu.memory_space<vmem>>, vector<2x32xf32>
      %32 = vector.broadcast %30 : vector<2x1xf32> to vector<2x32xf32>
      %33 = arith.divf %31, %32 : vector<2x32xf32>
      %c0_28 = arith.constant 0 : index
      %c0_29 = arith.constant 0 : index
      %34 = vector.load %arg4[%c0_28, %c0_29] : memref<64x3xf32, #tpu.memory_space<vmem>>, vector<32x3xf32>
      %cst_30 = arith.constant dense<0.000000e+00> : vector<2x3xf32>
      %35 = tpu.matmul %33, %34, %cst_30 {dimension_numbers = #tpu.dot_dimension_numbers<[1], [0], [0], [1], [0, 0, 1, 1], [], []>} : vector<2x32xf32>, vector<32x3xf32>, vector<2x3xf32> -> vector<2x3xf32>
      %c0_31 = arith.constant 0 : index
      %c0_32 = arith.constant 0 : index
      %36 = vector.load %arg8[%c0_31, %c0_32] : memref<2x32xf32, #tpu.memory_space<vmem>>, vector<2x32xf32>
      %c32 = arith.constant 32 : index
      %c0_33 = arith.constant 0 : index
      %37 = vector.load %arg4[%c32, %c0_33] : memref<64x3xf32, #tpu.memory_space<vmem>>, vector<32x3xf32>
      %cst_34 = arith.constant dense<0.000000e+00> : vector<2x3xf32>
      %38 = tpu.matmul %36, %37, %cst_34 {dimension_numbers = #tpu.dot_dimension_numbers<[1], [0], [0], [1], [0, 0, 1, 1], [], []>} : vector<2x32xf32>, vector<32x3xf32>, vector<2x3xf32> -> vector<2x3xf32>
      %39 = arith.addf %35, %38 : vector<2x3xf32>
      %c0_35 = arith.constant 0 : index
      %c0_36 = arith.constant 0 : index
      %40 = vector.load %arg5[%c0_35, %c0_36] : memref<1x3xf32, #tpu.memory_space<vmem>>, vector<1x3xf32>
      %41 = vector.broadcast %40 : vector<1x3xf32> to vector<2x3xf32>
      %42 = arith.addf %39, %41 : vector<2x3xf32>
      %c0_37 = arith.constant 0 : index
      %c0_38 = arith.constant 0 : index
      %43 = vector.load %arg6[%c0_37, %c0_38] : memref<2x3xf32, #tpu.memory_space<vmem>>, vector<2x3xf32>
      tpu.vector_store %arg6[%c0_37, %c0_38], %42 {strides = array<i32>} : memref<2x3xf32, #tpu.memory_space<vmem>>, vector<2x3xf32>,
    } else {
    }
    return
  }
  func.func @transform_0(%arg0: i32, %arg1: i32) -> (i32, i32, i32) {
    %c0_i32 = arith.constant 0 : i32
    %c0_i32_0 = arith.constant 0 : i32
    return %arg0, %arg1, %c0_i32 : i32, i32, i32
  }
  func.func @transform_1(%arg0: i32, %arg1: i32) -> (i32, i32, i32) {
    %c0_i32 = arith.constant 0 : i32
    %c0_i32_0 = arith.constant 0 : i32
    return %arg0, %arg1, %c0_i32 : i32, i32, i32
  }
  func.func @transform_2(%arg0: i32, %arg1: i32) -> (i32, i32) {
    %c0_i32 = arith.constant 0 : i32
    %c0_i32_0 = arith.constant 0 : i32
    %c0_i32_1 = arith.constant 0 : i32
    return %c0_i32, %c0_i32_0 : i32, i32
  }
  func.func @transform_3(%arg0: i32, %arg1: i32) -> (i32, i32) {
    %c0_i32 = arith.constant 0 : i32
    %c0_i32_0 = arith.constant 0 : i32
    %c0_i32_1 = arith.constant 0 : i32
    return %c0_i32, %c0_i32_0 : i32, i32
  }
  func.func @transform_4(%arg0: i32, %arg1: i32) -> (i32, i32) {
    %c0_i32 = arith.constant 0 : i32
    %c0_i32_0 = arith.constant 0 : i32
    return %arg0, %c0_i32 : i32, i32
  }
}

</mosaic_0001>

<bundles_post_ra>
// kernel: tpu_custom_call.1
= control target key start
LH: loop header
LB: loop body
LE: loop exit
PB: predicated region body
PF: predicated region fallthrough
CT: control target
= control target key end

     0   :  { %9 = vsyncpa [#allocation8], 0  ;;  %s893_s15 = smov 0   ;;  %s895_s16 = smov 0   ;;  %s1031_s0 = inlined_call_operand.vmem [shape: f32[2,16,32], index: 0, kind: input, shape index: {}]   ;;  %s1032_s1 = inlined_call_operand.vmem [shape: f32[2,16,1], index: 1, kind: input, shape index: {}]   ;;  %s1033_s2 = inlined_call_operand.vmem [shape: f32[64,3], index: 2, kind: input, shape index: {}]   ;;  %s1034_s3 = inlined_call_operand.vmem [shape: f32[1,3], index: 3, kind: input, shape index: {}]   ;;  %s1035_s4 = inlined_call_operand.hbm [shape: f32[2,3], index: 4, kind: output, shape index: {}]  }
   0x1   :  { %s897_s17 = smov 0   ;;  %s899_s18 = smov 0  }
   0x2   :  { %s901_s19 = smov 0  }
   0x3 LB: > { %s684_s20 = sadd.s32 4294967295, %s859_s19   ;;  %s24_s21 = sadd.s32 1, %s855_s18  ;;  %s859_s19 = sphi %s901_s19, %s15_s19   ;;  %s855_s18 = sphi %s899_s18, %s1041_s18   ;;  %s851_s17 = sphi %s897_s17, %s1040_s17   ;;  %s847_s16 = sphi %s895_s16, %s1039_s16   ;;  %s843_s15 = sphi %s893_s15, %s1038_s15  }
   0x4   : > { %p25_p0 = scmp.ge.s32.totalorder %s24_s21, 2  ;;  %p43_p1 = scmp.ne.s32.totalorder %s847_s16, %s843_s15 }
   0x5   : > { %p44_p2 = scmp.eq.s32.totalorder %s859_s19, 0  ;;  %s36_s24 = sadd.s32 1, %s847_s16 }
   0x6   : > { %s1043_s21 = smov (%p25_p0, %s24_s21), 0  ;;  %p686_p5 = scmp.ge.s32.totalorder %s859_s19, 2 }
   0x7   : > { %p925_p3 = por %p44_p2, %p43_p1  ;;  %s32_s23 = ssub.s32 %s855_s18, %s1043_s21 }
   0x8   : > { %p34_p4 = scmp.eq.s32.totalorder %s32_s23, 0  ;;  %171 = sbr.rel (%p686_p5) target bundleno = 23 (0x17), region = 24 }
   0xa   : > { %s933_s25 = scalar_select %p34_p4, %s847_s16, %s36_s24  }
   0xd   : > { %174 = sbr.rel (!%p925_p3) target bundleno = 18 (0x12), region = 28  ;;  %s176_s26 = sand.u32 (%p925_p3), 1, %s847_s16  }
   0xe   : > { %s688_s27 = sshll.u32 (%p925_p3), %s855_s18, 3  ;;  %s687_s28 = sshll.u32 (%p925_p3), %s176_s26, 4 }
   0xf   : > { %s183_s5 = scalar_lea.vmem (%p925_p3), %s1031_s0, %s688_s27  ;;  %s178_s6 = scalar_lea.vmem (%p925_p3), [#allocation5], %s687_s28 }
  0x10   : > { %v214_v0 = vld [vmem:[%s183_s5] sm:$0xff] (%p925_p3)  ;;  %v216_v1 = vld [vmem:[%s183_s5 + $0x10] sm:$0xff] (%p925_p3) }
  0x11   : > { %215 = vst [vmem:[%s178_s6] sm:$0xff] (%p925_p3), %v214_v0  ;;  %217 = vst [vmem:[%s178_s6 + $0x8] sm:$0xff] (%p925_p3), %v216_v1 }
  0x12 PF: > { %223 = sbr.rel (!%p925_p3) target bundleno = 23 (0x17), region = 66  ;;  %s225_s7 = sand.u32 (%p925_p3), 1, %s847_s16  }
  0x13   : > { %s690_s8 = sshll.u32 (%p925_p3), %s855_s18, 3  ;;  %s689_s9 = sshll.u32 (%p925_p3), %s225_s7, 4 }
  0x14   : > { %s232_s12 = scalar_lea.vmem (%p925_p3), %s1032_s1, %s690_s8  ;;  %s227_s13 = scalar_lea.vmem (%p925_p3), [#allocation6], %s689_s9 }
  0x15   : > { %v263_v2 = vld [vmem:[%s232_s12] sm:$0xff] (%p925_p3)  ;;  %v265_v3 = vld [vmem:[%s232_s12 + $0x10] sm:$0xff] (%p925_p3) }
  0x16   : > { %264 = vst [vmem:[%s227_s13] sm:$0xff] (%p925_p3), %v263_v2  ;;  %266 = vst [vmem:[%s227_s13 + $0x8] sm:$0xff] (%p925_p3), %v265_v3 }
  0x17 PF: > { %p691_p6 = scmp.ge.s32.totalorder %s859_s19, 1  ;;  %p271_p7 = scmp.lt.s32.totalorder %s859_s19, 3 }
  0x19   : > { %p272_p8 = pnand %p691_p6, %p271_p7 }
  0x1a   : > { %s278_s14 = sand.u32 (!%p272_p8), 1, %s843_s15   ;;  %p694_p9 = scmp.ne.s32.totalorder (!%p272_p8), %s851_s17, 0 }
  0x1b   : > { %275 = sbr.rel (%p272_p8) target bundleno = 546 (0x222), region = 104  ;;  %s953_s22 = sshll.u32 (!%p272_p8), %s278_s14, 4 }
  0x1c   : > { %s280_s23 = scalar_lea.vmem (!%p272_p8), [#allocation5], %s953_s22  ;;  %s287_s24 = scalar_lea.vmem (!%p272_p8), [#allocation6], %s953_s22 }
  0x20   : > { %314 = sbr.rel (%p694_p9) target bundleno = 40 (0x28), region = 116 }
  0x25   : > { %vm315_vm0 = vcmask 254976   ;;  %vm318_vm1 = vcmask 1024   ;;  %v861_v4 = vmov 0.0   ;;  %v862_v5 = vmov -1e+09  }
  0x26   : > { %316 = vst.msk [vmem:[#allocation2] sm:$0x3] %vm315_vm0, %v861_v4  ;;  %317 = vst.msk [vmem:[#allocation3] sm:$0x3] %vm315_vm0, %v862_v5 }
  0x27   : > { %319 = vst.msk [vmem:[#allocation4] sm:$0x3] %vm318_vm1, %v861_v4 }
  0x28 PF: > { %v322_v6 = vld [vmem:[%s287_s24] sm:$0xff]  ;;  %vm396_vm2 = vcmask 7168   ;;  %v323_v7 = vld [vmem:[%s287_s24 + $0x8] sm:$0xff]  ;;  %v863_v8 = vmov 0   ;;  %vm356_vm5 = vcmask 1041409   ;;  %vm416_vm6 = vcmask 1024  }
  0x29   : > { %789 = vset.pattern.permute.xlu1 %v863_v8  ;;  %788 = vset.pattern.permute.xlu0 %v863_v8  ;;  %v397_v9 = vsel %vm396_vm2, %v322_v6, 0.0  ;;  %vm324_vm3 = vcmp.eq.f32.partialorder %v322_v6, 0.0  ;;  %v404_v10 = vsel %vm396_vm2, %v323_v7, 0.0  ;;  %vm325_vm4 = vcmp.eq.f32.partialorder %v323_v7, 0.0  ;;  %v320_v28 = vld [vmem:[%s280_s23] sm:$0xff]  ;;  %v321_v32 = vld [vmem:[%s280_s23 + $0x8] sm:$0xff] }
  0x2a   : > { %365 = vperm.xlu1 %789, %v322_v6   ;;  %v398_v11 = vrot.slane %v397_v9, 4  ;;  %v326_v12 = vsel %vm324_vm3, 1, %v863_v8  ;;  %v405_v13 = vrot.slane %v404_v10, 4  ;;  %v327_v16 = vsel %vm325_vm4, 1, %v863_v8  ;;  %p695_p10 = scmp.ne.s32.totalorder %s851_s17, 1 }
  0x2b   : > { %329 = vperm.xlu0 %788, %v326_v12   ;;  %vm339_vm7 = vcmask 261120   ;;  %vm360_vm10 = vcmask 254976  }
  0x2c   : > { %v399_v14 = vadd.f32 %v398_v11, %v397_v9  ;;  %v406_v15 = vadd.f32 %v405_v13, %v404_v10 }
  0x2d   : > { %v362_v63 = vld [vmem:[#allocation2] sm:$0x3]  ;;  %v338_v2 = vld [vmem:[#allocation3] sm:$0x3] }
  0x2e   : > { %v400_v17 = vrot.slane %v399_v14, 2  ;;  %v407_v18 = vrot.slane %v406_v15, 2  ;;  %370 = vperm.xlu1 %789, %v323_v7   ;;  %v395_v24 = vld [vmem:[#allocation4] sm:$0x3] }
  0x2f   : > { %332 = vperm.xlu0 %788, %v327_v16  }
  0x30   : > { %v401_v19 = vadd.f32 %v400_v17, %v399_v14  ;;  %v408_v20 = vadd.f32 %v407_v18, %v406_v15 }
  0x32   : > { %v402_v21 = vrot.slane %v401_v19, 1  ;;  %v409_v22 = vrot.slane %v408_v20, 1 }
  0x34   : > { %v403_v23 = vadd.f32 %v402_v21, %v401_v19  ;;  %v410_v25 = vadd.f32 %v409_v22, %v408_v20 }
  0x36   : > { %v413_v26 = vsel %vm356_vm5, %v410_v25, %v403_v23 }
  0x37   : > { %v415_v27 = vadd.f32 %v413_v26, %v395_v24 }
  0x39   : > { %417 = vst.msk [vmem:[#allocation4] sm:$0x3] %vm416_vm6, %v415_v27 }
  0xa5   : > { %v366_v29 = vpop.permute.xlu1 %365 }
  0xa6   : > { %v373_v30 = vmul.f32 %v366_v29, %v320_v28  ;;  %v330_v31 = vpop.permute.xlu0 %329 }
  0xa7   : > { %vm334_vm8 = vcmp.eq.s32.totalorder %v330_v31, 1 }
  0xa8   : > { %v375_v33 = vsel %vm339_vm7, %v373_v30, 0.0  ;;  %v336_v34 = vsel %vm334_vm8, -1e+09, %v320_v28 }
  0xa9   : > { %v376_v35 = vrot.slane %v375_v33, 4  ;;  %v340_v36 = vsel %vm339_vm7, %v336_v34, -inf  ;;  %v371_v37 = vpop.permute.xlu1 %370 }
  0xaa   : > { %v341_v38 = vrot.slane %v340_v36, 4  ;;  %v374_v39 = vmul.f32 %v371_v37, %v321_v32  ;;  %v333_v40 = vpop.permute.xlu0 %332 }
  0xab   : > { %v377_v41 = vadd.f32 %v376_v35, %v375_v33  ;;  %vm335_vm9 = vcmp.eq.s32.totalorder %v333_v40, 1 }
  0xac   : > { %v342_v42 = vmax.f32 %v340_v36, %v341_v38  ;;  %v382_v43 = vsel %vm339_vm7, %v374_v39, 0.0  ;;  %v337_v44 = vsel %vm335_vm9, -1e+09, %v321_v32 }
  0xad   : > { %v378_v45 = vrot.slane %v377_v41, 2  ;;  %v383_v46 = vrot.slane %v382_v43, 4  ;;  %v347_v47 = vsel %vm339_vm7, %v337_v44, -inf }
  0xae   : > { %v343_v48 = vrot.slane %v342_v42, 2  ;;  %v348_v49 = vrot.slane %v347_v47, 4 }
  0xaf   : > { %v379_v50 = vadd.f32 %v378_v45, %v377_v41  ;;  %v384_v51 = vadd.f32 %v383_v46, %v382_v43 }
  0xb0   : > { %v344_v52 = vmax.f32 %v342_v42, %v343_v48  ;;  %v349_v53 = vmax.f32 %v347_v47, %v348_v49 }
  0xb1   : > { %v385_v54 = vrot.slane %v384_v51, 2  ;;  %v380_v56 = vrot.slane %v379_v50, 1 }
  0xb2   : > { %v350_v55 = vrot.slane %v349_v53, 2  ;;  %v345_v58 = vrot.slane %v344_v52, 1 }
  0xb3   : > { %v386_v57 = vadd.f32 %v385_v54, %v384_v51  ;;  %v381_v62 = vadd.f32 %v380_v56, %v379_v50 }
  0xb4   : > { %v351_v59 = vmax.f32 %v349_v53, %v350_v55  ;;  %v346_v1 = vmax.f32 %v344_v52, %v345_v58 }
  0xb5   : > { %v387_v60 = vrot.slane %v386_v57, 1 }
  0xb6   : > { %v352_v61 = vrot.slane %v351_v59, 1 }
  0xb7   : > { %v388_v0 = vadd.f32 %v387_v60, %v386_v57 }
  0xb8   : > { %v353_v3 = vmax.f32 %v351_v59, %v352_v61 }
  0xb9   : > { %v391_v4 = vsel %vm356_vm5, %v388_v0, %v381_v62  ;;  %421 = sbr.rel (%p695_p10) target bundleno = 531 (0x213), region = 120 }
  0xba   : > { %v393_v5 = vadd.f32 %v391_v4, %v362_v63  ;;  %v357_v6 = vsel %vm356_vm5, %v353_v3, %v346_v1 }
  0xbb   : > { %v359_v7 = vmax.f32 %v338_v2, %v357_v6 }
  0xbc   : > { %394 = vst.msk [vmem:[#allocation2] sm:$0x3] %vm360_vm10, %v393_v5 }
  0xbd   : > { %361 = vst.msk [vmem:[#allocation3] sm:$0x3] %vm360_vm10, %v359_v7 }
  0xbe   : > { %v422_v8 = vld [vmem:[#allocation4] sm:$0x3]  ;;  %v440_v9 = vld [vmem:[%s1033_s2 + $0x38] sm:$0xff]  ;;  %v864_v10 = vmov 0   ;;  %v865_v12 = vmov 0.0   ;;  %v439_v13 = vld [vmem:[%s1033_s2 + $0x30] sm:$0xff] }
  0xbf   : > { %790 = vset.pattern.permute.xlu0 %v864_v10  ;;  %v423_v11 = vmax.f32 %v422_v8, 1e-09  ;;  %713 = vmatprep.subr.mxu0 %v865_v12  ;;  %v435_v14 = vld [vmem:[%s1033_s2 + $0x18] sm:$0xff]  ;;  %v438_v15 = vld [vmem:[%s1033_s2 + $0x28] sm:$0xff]  ;;  %v434_v16 = vld [vmem:[%s1033_s2 + $0x10] sm:$0xff]  ;;  %vm866_vm11 = vmmov 0  }
  0xc0   : > { %714 = vmatpush3.msra.mxu0 %v440_v9  ;;  %724 = vmatprep.subr.mxu1 %v865_v12  ;;  %v437_v17 = vld [vmem:[%s1033_s2 + $0x20] sm:$0xff]  ;;  %v433_v18 = vld [vmem:[%s1033_s2 + $0x8] sm:$0xff]  ;;  %vm595_vm12 = vcmask 17408  }
  0xc1   : > { %427 = vperm.xlu0 %790, %v423_v11   ;;  %715 = vmatprep.subr.mxu0 %v865_v12  ;;  %v432_v20 = vld [vmem:[%s1033_s2] sm:$0xff] }
  0xc2   : > { %716 = vmatpush3.msra.mxu0 %v439_v13  ;;  %725 = vmatpush3.msra.mxu1 %v435_v14  ;;  %v698_v28 = vld [vmem:[%s1034_s3] ss:$0 sm:$0xff] }
  0xc3   : > { %717 = vmatprep.subr.mxu0 %v865_v12  ;;  %726 = vmatprep.subr.mxu1 %v865_v12  ;;  %v424_v22 = vld [vmem:[#allocation2] sm:$0x3] }
  0xc4   : > { %718 = vmatpush3.msra.mxu0 %v438_v15  ;;  %727 = vmatpush3.msra.mxu1 %v434_v16  ;;  %v436_v19 = vld [vmem:[#allocation3] sm:$0x3] }
  0xc5   : > { %719 = vmatprep.subr.mxu0 %v865_v12  ;;  %728 = vmatprep.subr.mxu1 %v865_v12 }
  0xc6   : > { %720 = vmatpush3.msra.mxu0 %v437_v17  ;;  %721 = vmatprep.mubr.msk.f32.mxu0 %vm866_vm11, %v865_v12 }
  0xc7   : > { %729 = vmatpush3.msra.mxu1 %v433_v18  ;;  %722 = vmatmul.mubr.msk.f32.vlgmr.msra.gmra.mxu0 %vm339_vm7, %v436_v19 }
  0xc8   : > { %730 = vmatprep.subr.mxu1 %v865_v12  ;;  %732 = vmatprep.mubr.msk.f32.mxu1 %vm866_vm11, %v865_v12 }
  0xc9   : > { %731 = vmatpush3.msra.mxu1 %v432_v20 }
 0x13c   : > { %v428_v21 = vpop.permute.xlu0 %427 }
 0x13d   : > { %791 = vrcp.f32 %v428_v21 }
 0x14a   : > { %v792_v23 = vpop.eup %791 }
 0x14b   : > { %v431_v24 = vmul.f32 %v792_v23, %v424_v22 }
 0x14d   : > { %733 = vmatmul.mubr.msk.f32.vlgmr.msra.gmra.mxu1 %vm339_vm7, %v431_v24 }
 0x187   : > { %v510_v25 = vpop.f32.mrf.mxu0 }
 0x189   : > { %v723_v26 = vpop.f32.mrf.mxu0 }
 0x20d   : > { %v583_v27 = vpop.f32.mrf.mxu1 }
 0x20e   : > { %v584_v29 = vadd.f32 %v583_v27, %v510_v25 }
 0x20f   : > { %v734_v30 = vpop.f32.mrf.mxu1 }
 0x210   : > { %v594_v31 = vadd.f32 %v698_v28, %v584_v29 }
 0x212   : > { %596 = vst.msk [vmem:[#allocation7] sm:$0x3] %vm595_vm12, %v594_v31 }
 0x213 PF: > { %p1001_p11 = scmp.eq.s32.totalorder %s684_s20, 1  ;;  %s867_s24 = smov [#allocation7]  }
 0x214   : > { %s606_s15 = sshll.u32 %s867_s24, 4  ;;  %s607_s15 = int_to_ptr.vmem [resolvable:$true] %s606_s15 }
 0x215   : > { %s793_s26 = scalar_lea.vmem %s607_s15, 32  ;;  %p800_p1 = scmp.lt.s32.totalorder %s607_s15, %s607_s15 }
 0x216   : > { %p794_p12 = scmp.ne.s32.totalorder %s607_s15, %s793_s26  ;;  %p801_p2 = scmp.lt.s32.totalorder %s793_s26, %s793_s26 }
 0x218   : > { %p795_p13 = pnand %p794_p12, %p1001_p11  ;;  %p802_p3 = por %p801_p2, %p800_p1 }
 0x21a   : > { %p796_p0 = pneg %p795_p13 }
 0x21c   : > { %p803_p4 = pnand %p802_p3, %p796_p0 }
 0x21e   : > { %806 = shalt.err (!%p803_p4)
}
 0x21f   : > { %736 = dma.vmem_to_hbm [thread:$0]  (%p1001_p11), %s607_s15, 32, %s1035_s4, [#allocation8]  }
 0x220   : > { %838 = dma.done.wait (%p1001_p11), [#allocation8], 32  }
 0x221   : > { %840 = vsyncadd (%p1001_p11), [#allocation8], 4294967264 }
 0x222 PF: > { %s15_s19 = sadd.s32 1, %s859_s19   ;;  %s1038_s15 = smov %s847_s16 }
 0x223   : > { %p12_p5 = scmp.ge.s32.totalorder %s15_s19, 4   ;;  %s1039_s16 = smov %s933_s25 }
 0x224   : > { %s1040_s17 = smov %s855_s18  ;;  %s1041_s18 = smov %s1043_s21 }
 0x225   :  { %14 = sbr.rel (!%p12_p5) target bundleno = 3 (0x3), region = 161 }
 0x22a   :  { %619 = vsyncpa [#allocation8], 1 }
 0x22b   :  { %621 = vsyncpa [#allocation8 + $0x1], 1 }

</bundles_post_ra>
